<compile_context>
chip_gen: v7x
topology: tpu7x:2x2x1
jax: 0.10.0
libtpu: 0.0.40
codegen_flags: <defaults>
</compile_context>

<pallas_src>
import jax
import jax.numpy as jnp
from jax.experimental import pallas as pl
from jax.experimental.pallas import tpu as pltpu

H0 = 128   # per-branch first hidden width
H1 = 64    # per-branch second hidden width


def multinet_kernel(xh_ref, xm_ref,
                    wh0_ref, wm0_ref, b0_ref,
                    w1_ref, b1_ref,
                    wf_ref, bf_ref,
                    out_ref):
    # ---- layer 0: per-branch Linear (bf16 MXU, f32 accumulate) ------------
    h0 = jnp.dot(xh_ref[...], wh0_ref[...], preferred_element_type=jnp.float32)
    m0 = jnp.dot(xm_ref[...], wm0_ref[...], preferred_element_type=jnp.float32)
    # bias + ReLU in f32 (Dropout == identity at inference)
    a0 = jnp.maximum(jnp.concatenate([h0, m0], axis=-1) + b0_ref[...], 0.0)

    # ---- layer 1: both branches fused as one block-diagonal matmul --------
    # (TILE_B, 256) @ blockdiag(wh1, wm1) (256, 128) -> [h1 | m1]
    a1 = jnp.dot(a0.astype(jnp.bfloat16), w1_ref[...],
                 preferred_element_type=jnp.float32)
    a1 = jnp.maximum(a1 + b1_ref[...], 0.0)

    # ---- head: concat + Linear(128 -> 1) as VPU multiply + lane reduce ----
    pred = jnp.sum(a1 * wf_ref[...], axis=-1, keepdims=True) + bf_ref[0, 0]
    out_ref[...] = pred.astype(out_ref.dtype)


def multinet_forward(xh, xm, params, *, tile_b=1024):
    """Fused forward pass. xh: (B, in_hist), xm: (B, in_meth) -> (B, 1) f32."""
    B, in_hist = xh.shape
    _, in_meth = xm.shape

    # Batch tile: full batch for small B, otherwise a lane/sublane-friendly tile.
    tile_b = min(tile_b, B)
    grid = (pl.cdiv(B, tile_b),)

    # bf16 operands for the MXU; halves the only O(B) HBM stream.
    xh = xh.astype(jnp.bfloat16)
    xm = xm.astype(jnp.bfloat16)

    batch_map = lambda i: (i, 0)   # tiles move along the batch axis
    const_map = lambda i: (0, 0)   # weights / biases stay resident in VMEM

    in_specs = [
        pl.BlockSpec((tile_b, in_hist), batch_map),
        pl.BlockSpec((tile_b, in_meth), batch_map),
        pl.BlockSpec((in_hist, H0), const_map),
        pl.BlockSpec((in_meth, H0), const_map),
        pl.BlockSpec((1, 2 * H0), const_map),
        pl.BlockSpec((2 * H0, 2 * H1), const_map),
        pl.BlockSpec((1, 2 * H1), const_map),
        pl.BlockSpec((1, 2 * H1), const_map),
        pl.BlockSpec((1, 1), const_map, memory_space=pltpu.MemorySpace.SMEM),
    ]
    out_specs = pl.BlockSpec((tile_b, 1), batch_map)

    return pl.pallas_call(
        multinet_kernel,
        out_shape=jax.ShapeDtypeStruct((B, 1), jnp.float32),
        grid=grid,
        in_specs=in_specs,
        out_specs=out_specs,
        compiler_params=pltpu.CompilerParams(
            dimension_semantics=("parallel",)),
    )(xh, xm,
      params["wh0"], params["wm0"], params["b0"],
      params["w1"], params["b1"],
      params["wf"], params["bf"])


def init_raw_params(key, in_hist, in_meth, h0=H0, h1=H1):
    """Per-layer f32 parameters in the original (unfused) module layout."""
    ks = jax.random.split(key, 5)

    def linear(k, fan_in, fan_out):
        kw, kb = jax.random.split(k)
        scale = 1.0 / jnp.sqrt(jnp.float32(fan_in))
        w = jax.random.uniform(kw, (fan_in, fan_out), jnp.float32, -scale, scale)
        b = jax.random.uniform(kb, (1, fan_out), jnp.float32, -scale, scale)
        return w, b

    wh0, bh0 = linear(ks[0], in_hist, h0)
    wh1, bh1 = linear(ks[1], h0, h1)
    wm0, bm0 = linear(ks[2], in_meth, h0)
    wm1, bm1 = linear(ks[3], h0, h1)
    wf, bf = linear(ks[4], 2 * h1, 1)       # final Linear(128 -> 1)
    return dict(wh0=wh0, bh0=bh0, wh1=wh1, bh1=bh1,
                wm0=wm0, bm0=bm0, wm1=wm1, bm1=bm1,
                wf=wf, bf=bf)


def pack_params(raw, h0=H0, h1=H1):
    """Pre-pack parameters for the fused kernel (bf16 matmul weights)."""
    # Block-diagonal layer-1 weight: output is already [h1 | m1].
    w1 = jnp.zeros((2 * h0, 2 * h1), jnp.float32)
    w1 = w1.at[:h0, :h1].set(raw["wh1"])
    w1 = w1.at[h0:, h1:].set(raw["wm1"])
    return dict(
        wh0=raw["wh0"].astype(jnp.bfloat16),
        wm0=raw["wm0"].astype(jnp.bfloat16),
        b0=jnp.concatenate([raw["bh0"], raw["bm0"]], axis=1),     # (1, 256) f32
        w1=w1.astype(jnp.bfloat16),                               # (256, 128) bf16
        b1=jnp.concatenate([raw["bh1"], raw["bm1"]], axis=1),     # (1, 128) f32
        wf=raw["wf"].reshape(1, 2 * h1),                          # (1, 128) f32 head row
        bf=raw["bf"].reshape(1, 1),                               # (1, 1)  f32 SMEM scalar
    )


def reference_forward(xh, xm, raw):
    """Pure-JAX reference in the original module structure (eval mode),
    with the same bf16-operand / f32-accumulate matmul precision as the kernel."""
    def lin(x, w, b):
        return jnp.dot(x.astype(jnp.bfloat16), w.astype(jnp.bfloat16),
                       preferred_element_type=jnp.float32) + b

    h = jnp.maximum(lin(xh, raw["wh0"], raw["bh0"]), 0.0)
    h = jnp.maximum(lin(h, raw["wh1"], raw["bh1"]), 0.0)
    m = jnp.maximum(lin(xm, raw["wm0"], raw["bm0"]), 0.0)
    m = jnp.maximum(lin(m, raw["wm1"], raw["bm1"]), 0.0)
    comb = jnp.concatenate([h, m], axis=1)
    wf_row = raw["wf"].reshape(1, -1)
    return jnp.sum(comb * wf_row, axis=-1, keepdims=True) + raw["bf"]


if __name__ == "__main__":
    key = jax.random.PRNGKey(0)
    k_param, k_xh, k_xm = jax.random.split(key, 3)

    B, IN_HIST, IN_METH = 2, 32, 16
    raw = init_raw_params(k_param, IN_HIST, IN_METH)
    params = pack_params(raw)

    xh = jax.random.normal(k_xh, (B, IN_HIST), jnp.float32)
    xm = jax.random.normal(k_xm, (B, IN_METH), jnp.float32)

    pred = multinet_forward(xh, xm, params)
    pred = jax.block_until_ready(pred)

    ref = reference_forward(xh, xm, raw)
    assert pred.shape == (B, 1)
    assert jnp.allclose(pred, ref, atol=1e-3, rtol=1e-3), (pred, ref)

    print("KERNEL_OK")
</pallas_src>

<mosaic_0001>
module attributes {stable_mosaic.version = 11 : i64} {
  func.func @multinet_kernel(%arg0: i32, %arg1: memref<2x32xbf16, #tpu.memory_space<vmem>>, %arg2: memref<2x16xbf16, #tpu.memory_space<vmem>>, %arg3: memref<32x128xbf16, #tpu.memory_space<vmem>>, %arg4: memref<16x128xbf16, #tpu.memory_space<vmem>>, %arg5: memref<1x256xf32, #tpu.memory_space<vmem>>, %arg6: memref<256x128xbf16, #tpu.memory_space<vmem>>, %arg7: memref<1x128xf32, #tpu.memory_space<vmem>>, %arg8: memref<1x128xf32, #tpu.memory_space<vmem>>, %arg9: memref<1x1xf32, #tpu.memory_space<smem>>, %arg10: memref<2x1xf32, #tpu.memory_space<vmem>>) attributes {dimension_semantics = [#tpu.dimension_semantics<parallel>], iteration_bounds = array<i64: 1>, scalar_prefetch = 0 : i64, scratch_operands = 0 : i64, tpu.core_type = #tpu.core_type<tc>, window_params = [{transform_indices = @transform_0, window_bounds = array<i64: 2, 32>}, {transform_indices = @transform_1, window_bounds = array<i64: 2, 16>}, {pipeline_mode = #tpu.pipeline_mode<synchronous>, transform_indices = @transform_2, window_bounds = array<i64: 32, 128>}, {pipeline_mode = #tpu.pipeline_mode<synchronous>, transform_indices = @transform_3, window_bounds = array<i64: 16, 128>}, {pipeline_mode = #tpu.pipeline_mode<synchronous>, transform_indices = @transform_4, window_bounds = array<i64: 1, 256>}, {pipeline_mode = #tpu.pipeline_mode<synchronous>, transform_indices = @transform_5, window_bounds = array<i64: 256, 128>}, {pipeline_mode = #tpu.pipeline_mode<synchronous>, transform_indices = @transform_6, window_bounds = array<i64: 1, 128>}, {pipeline_mode = #tpu.pipeline_mode<synchronous>, transform_indices = @transform_7, window_bounds = array<i64: 1, 128>}, {transform_indices = @transform_8, window_bounds = array<i64: 1, 1>}, {transform_indices = @transform_9, window_bounds = array<i64: 2, 1>}]} {
    %c0 = arith.constant 0 : index
    %c0_0 = arith.constant 0 : index
    %0 = vector.load %arg1[%c0, %c0_0] : memref<2x32xbf16, #tpu.memory_space<vmem>>, vector<2x32xbf16>
    %c0_1 = arith.constant 0 : index
    %c0_2 = arith.constant 0 : index
    %1 = vector.load %arg3[%c0_1, %c0_2] : memref<32x128xbf16, #tpu.memory_space<vmem>>, vector<32x128xbf16>
    %cst = arith.constant dense<0.000000e+00> : vector<2x128xf32>
    %2 = tpu.matmul %0, %1, %cst {dimension_numbers = #tpu.dot_dimension_numbers<[1], [0], [0], [1], [0, 0, 1, 1], [], []>} : vector<2x32xbf16>, vector<32x128xbf16>, vector<2x128xf32> -> vector<2x128xf32>
    %c0_3 = arith.constant 0 : index
    %c0_4 = arith.constant 0 : index
    %3 = vector.load %arg2[%c0_3, %c0_4] : memref<2x16xbf16, #tpu.memory_space<vmem>>, vector<2x16xbf16>
    %c0_5 = arith.constant 0 : index
    %c0_6 = arith.constant 0 : index
    %4 = vector.load %arg4[%c0_5, %c0_6] : memref<16x128xbf16, #tpu.memory_space<vmem>>, vector<16x128xbf16>
    %cst_7 = arith.constant dense<0.000000e+00> : vector<2x128xf32>
    %5 = tpu.matmul %3, %4, %cst_7 {dimension_numbers = #tpu.dot_dimension_numbers<[1], [0], [0], [1], [0, 0, 1, 1], [], []>} : vector<2x16xbf16>, vector<16x128xbf16>, vector<2x128xf32> -> vector<2x128xf32>
    %6 = tpu.concatenate %2, %5 in 1 : vector<2x128xf32>, vector<2x128xf32> -> vector<2x256xf32>
    %c0_8 = arith.constant 0 : index
    %c0_9 = arith.constant 0 : index
    %7 = vector.load %arg5[%c0_8, %c0_9] : memref<1x256xf32, #tpu.memory_space<vmem>>, vector<1x256xf32>
    %8 = vector.broadcast %7 : vector<1x256xf32> to vector<2x256xf32>
    %9 = arith.addf %6, %8 : vector<2x256xf32>
    %cst_10 = arith.constant 0.000000e+00 : f32
    %10 = vector.broadcast %cst_10 : f32 to vector<2x256xf32>
    %11 = arith.maximumf %9, %10 : vector<2x256xf32>
    %12 = arith.truncf %11 : vector<2x256xf32> to vector<2x256xbf16>
    %c0_11 = arith.constant 0 : index
    %c0_12 = arith.constant 0 : index
    %13 = vector.load %arg6[%c0_11, %c0_12] : memref<256x128xbf16, #tpu.memory_space<vmem>>, vector<256x128xbf16>
    %cst_13 = arith.constant dense<0.000000e+00> : vector<2x128xf32>
    %14 = tpu.matmul %12, %13, %cst_13 {dimension_numbers = #tpu.dot_dimension_numbers<[1], [0], [0], [1], [0, 0, 1, 1], [], []>} : vector<2x256xbf16>, vector<256x128xbf16>, vector<2x128xf32> -> vector<2x128xf32>
    %c0_14 = arith.constant 0 : index
    %c0_15 = arith.constant 0 : index
    %15 = vector.load %arg7[%c0_14, %c0_15] : memref<1x128xf32, #tpu.memory_space<vmem>>, vector<1x128xf32>
    %16 = vector.broadcast %15 : vector<1x128xf32> to vector<2x128xf32>
    %17 = arith.addf %14, %16 : vector<2x128xf32>
    %cst_16 = arith.constant 0.000000e+00 : f32
    %18 = vector.broadcast %cst_16 : f32 to vector<2x128xf32>
    %19 = arith.maximumf %17, %18 : vector<2x128xf32>
    %c0_17 = arith.constant 0 : index
    %c0_18 = arith.constant 0 : index
    %20 = vector.load %arg8[%c0_17, %c0_18] : memref<1x128xf32, #tpu.memory_space<vmem>>, vector<1x128xf32>
    %21 = vector.broadcast %20 : vector<1x128xf32> to vector<2x128xf32>
    %22 = arith.mulf %19, %21 : vector<2x128xf32>
    %cst_19 = arith.constant dense<0.000000e+00> : vector<2xf32>
    %23 = vector.multi_reduction <add>, %22, %cst_19 [1] : vector<2x128xf32> to vector<2xf32>
    %24 = vector.shape_cast %23 : vector<2xf32> to vector<2x1xf32>
    %c0_20 = arith.constant 0 : index
    %c0_21 = arith.constant 0 : index
    %25 = memref.load %arg9[%c0_20, %c0_21] : memref<1x1xf32, #tpu.memory_space<smem>>
    %26 = vector.broadcast %25 : f32 to vector<2x1xf32>
    %27 = arith.addf %24, %26 : vector<2x1xf32>
    %c0_22 = arith.constant 0 : index
    %c0_23 = arith.constant 0 : index
    %28 = vector.load %arg10[%c0_22, %c0_23] : memref<2x1xf32, #tpu.memory_space<vmem>>, vector<2x1xf32>
    tpu.vector_store %arg10[%c0_22, %c0_23], %27 {strides = array<i32>} : memref<2x1xf32, #tpu.memory_space<vmem>>, vector<2x1xf32>,
    return
  }
  func.func @transform_0(%arg0: i32) -> (i32, i32) {
    %c0_i32 = arith.constant 0 : i32
    %c0_i32_0 = arith.constant 0 : i32
    return %arg0, %c0_i32 : i32, i32
  }
  func.func @transform_1(%arg0: i32) -> (i32, i32) {
    %c0_i32 = arith.constant 0 : i32
    %c0_i32_0 = arith.constant 0 : i32
    return %arg0, %c0_i32 : i32, i32
  }
  func.func @transform_2(%arg0: i32) -> (i32, i32) {
    %c0_i32 = arith.constant 0 : i32
    %c0_i32_0 = arith.constant 0 : i32
    %c0_i32_1 = arith.constant 0 : i32
    return %c0_i32, %c0_i32_0 : i32, i32
  }
  func.func @transform_3(%arg0: i32) -> (i32, i32) {
    %c0_i32 = arith.constant 0 : i32
    %c0_i32_0 = arith.constant 0 : i32
    %c0_i32_1 = arith.constant 0 : i32
    return %c0_i32, %c0_i32_0 : i32, i32
  }
  func.func @transform_4(%arg0: i32) -> (i32, i32) {
    %c0_i32 = arith.constant 0 : i32
    %c0_i32_0 = arith.constant 0 : i32
    %c0_i32_1 = arith.constant 0 : i32
    return %c0_i32, %c0_i32_0 : i32, i32
  }
  func.func @transform_5(%arg0: i32) -> (i32, i32) {
    %c0_i32 = arith.constant 0 : i32
    %c0_i32_0 = arith.constant 0 : i32
    %c0_i32_1 = arith.constant 0 : i32
    return %c0_i32, %c0_i32_0 : i32, i32
  }
  func.func @transform_6(%arg0: i32) -> (i32, i32) {
    %c0_i32 = arith.constant 0 : i32
    %c0_i32_0 = arith.constant 0 : i32
    %c0_i32_1 = arith.constant 0 : i32
    return %c0_i32, %c0_i32_0 : i32, i32
  }
  func.func @transform_7(%arg0: i32) -> (i32, i32) {
    %c0_i32 = arith.constant 0 : i32
    %c0_i32_0 = arith.constant 0 : i32
    %c0_i32_1 = arith.constant 0 : i32
    return %c0_i32, %c0_i32_0 : i32, i32
  }
  func.func @transform_8(%arg0: i32) -> (i32, i32) {
    %c0_i32 = arith.constant 0 : i32
    %c0_i32_0 = arith.constant 0 : i32
    %c0_i32_1 = arith.constant 0 : i32
    return %c0_i32, %c0_i32_0 : i32, i32
  }
  func.func @transform_9(%arg0: i32) -> (i32, i32) {
    %c0_i32 = arith.constant 0 : i32
    %c0_i32_0 = arith.constant 0 : i32
    return %arg0, %c0_i32 : i32, i32
  }
}

</mosaic_0001>

<bundles_post_ra>
// kernel: tpu_custom_call.1
= control target key start
LH: loop header
LB: loop body
LE: loop exit
PB: predicated region body
PF: predicated region fallthrough
CT: control target
= control target key end

     0   :  { %15 = vsyncpa [#allocation4], 0  ;;  %s636_s0 = inlined_call_operand.vmem [shape: bf16[2,32], index: 0, kind: input, shape index: {}]   ;;  %s637_s1 = inlined_call_operand.vmem [shape: bf16[2,16], index: 1, kind: input, shape index: {}]   ;;  %s638_s2 = inlined_call_operand.hbm [shape: bf16[32,128], index: 2, kind: input, shape index: {}]   ;;  %s639_s3 = inlined_call_operand.vmem [shape: bf16[16,128], index: 3, kind: input, shape index: {}]   ;;  %s640_s4 = inlined_call_operand.vmem [shape: f32[1,256], index: 4, kind: input, shape index: {}]   ;;  %s641_s5 = inlined_call_operand.hbm [shape: bf16[256,128], index: 5, kind: input, shape index: {}]   ;;  %s642_s6 = inlined_call_operand.vmem [shape: f32[1,128], index: 6, kind: input, shape index: {}]   ;;  %s643_s7 = inlined_call_operand.vmem [shape: f32[1,128], index: 7, kind: input, shape index: {}]   ;;  %s644_s8 = inlined_call_operand.<no memory space> [shape: f32[1,1], index: 8, kind: input, shape index: {}]   ;;  %s645_s9 = inlined_call_operand.vmem [shape: f32[2,1], index: 9, kind: output, shape index: {}]  }
   0x1   :  { %16 = vsyncpa [#allocation6], 0  ;;  %s530_s30 = smov [#allocation3]   ;;  %s482_s13 = scalar_lea.hbm %s638_s2, 256 }
   0x2   :  { %s26_s10 = sshll.u32 %s530_s30, 4  ;;  %p483_p0 = scmp.ne.s32.totalorder %s638_s2, %s482_s13  ;;  %s27_s10 = int_to_ptr.vmem [resolvable:$true] %s26_s10 }
   0x3   :  { %p486_p1 = scmp.lt.u32.totalorder %s482_s13, %s638_s2 }
   0x5   :  { %p488_p2 = pnand %p486_p1, %p483_p0 }
   0x7   :  { %491 = shalt.err (!%p488_p2)
}
   0x8   :  { %s492_s18 = scalar_lea.vmem %s27_s10, 256  ;;  %p497_p4 = scmp.lt.s32.totalorder %s27_s10, %s27_s10 }
   0x9   :  { %p493_p3 = scmp.ne.s32.totalorder %s27_s10, %s492_s18  ;;  %p498_p5 = scmp.lt.s32.totalorder %s492_s18, %s492_s18 }
   0xb   :  { %p499_p6 = por %p498_p5, %p497_p4 }
   0xd   :  { %p500_p7 = pnand %p499_p6, %p493_p3 }
   0xf   :  { %503 = shalt.err (!%p500_p7)
}
  0x10   :  { %s531_s19 = smov 64   ;;  %s532_s20 = smov 4  }
  0x11   :  { %32 = dma.hbm_to_vmem [thread:$0]  %s638_s2, 256, %s27_s10, [#allocation4], %s531_s19, %s531_s19, %s532_s20  }
  0x12   :  { %s533_s23 = smov [#allocation5]   ;;  %s504_s27 = scalar_lea.hbm %s641_s5, 2048 }
  0x13   :  { %s42_s24 = sshll.u32 %s533_s23, 4  ;;  %p505_p8 = scmp.ne.s32.totalorder %s641_s5, %s504_s27  ;;  %s43_s24 = int_to_ptr.vmem [resolvable:$true] %s42_s24 }
  0x14   :  { %p508_p9 = scmp.lt.u32.totalorder %s504_s27, %s641_s5 }
  0x16   :  { %p510_p10 = pnand %p508_p9, %p505_p8 }
  0x18   :  { %513 = shalt.err (!%p510_p10)
}
  0x19   :  { %s514_s12 = scalar_lea.vmem %s43_s24, 2048  ;;  %p519_p12 = scmp.lt.s32.totalorder %s43_s24, %s43_s24 }
  0x1a   :  { %p515_p11 = scmp.ne.s32.totalorder %s43_s24, %s514_s12  ;;  %p520_p13 = scmp.lt.s32.totalorder %s514_s12, %s514_s12 }
  0x1c   :  { %p521_p0 = por %p520_p13, %p519_p12 }
  0x1e   :  { %p522_p1 = pnand %p521_p0, %p515_p11 }
  0x20   :  { %525 = shalt.err (!%p522_p1)
}
  0x21   :  { %48 = dma.hbm_to_vmem [thread:$0]  %s641_s5, 2048, %s43_s24, [#allocation6], %s531_s19, %s531_s19, %s532_s20  }
  0x22   :  { %526 = dma.done.wait [#allocation4], 256  }
  0x23   :  { %527 = vsyncadd [#allocation4], 4294967040 }
  0x24   :  { %528 = dma.done.wait [#allocation6], 2048  }
  0x25   :  { %529 = vsyncadd [#allocation6], 4294965248  ;;  %v534_v0 = vmov 0.0   ;;  %vm535_vm0 = vmmov 0   ;;  %v463_v1 = vld [vmem:[#allocation3] sm:$0xff]   ;;  %v464_v2 = vld [vmem:[#allocation3 + $0x8] sm:$0xff]   ;;  %v178_v22 = vlaneseq  ;;  %v383_v54 = vstv %s644_s8 }
  0x26   :  { %443 = vmatprep.subr.bf16.mxu0 %v534_v0  ;;  %447 = vmatprep.mubr.msk.bf16.mxu0 %vm535_vm0, %v534_v0  ;;  %v62_v3 = vld [vmem:[%s636_s0] sm:$0x1]  ;;  %v466_v5 = vld [vmem:[#allocation5 + $0x40] sm:$0xff]   ;;  %vm79_vm1 = vcmask 261120   ;;  %v468_v7 = vld [vmem:[#allocation5 + $0x48] sm:$0xff]   ;;  %vm132_vm2 = vcmask 130048  }
  0x27   :  { %444 = vmatpush3.bf16.msra.mxu0 %v463_v1  ;;  %v465_v4 = vld [vmem:[%s639_s3] sm:$0xff]   ;;  %v467_v6 = vld [vmem:[#allocation5] sm:$0xff]   ;;  %421 = vmatprep.subr.bf16.mxu1 %v466_v5  ;;  %v469_v8 = vld [vmem:[#allocation5 + $0x8] sm:$0xff]   ;;  %v179_v23 = vshrl.u32 %v178_v22, 7  ;;  %vm378_vm3 = vcmask 1041408   ;;  %vm385_vm4 = vcmask 1024  }
  0x28   :  { %445 = vmatprep.subr.bf16.mxu0 %v534_v0  ;;  %422 = vmatpush3.bf16.msra.mxu1 %v467_v6  ;;  %v470_v9 = vld [vmem:[#allocation5 + $0x50] sm:$0xff]   ;;  %v472_v11 = vld [vmem:[#allocation5 + $0x58] sm:$0xff]   ;;  %v474_v14 = vld [vmem:[#allocation5 + $0x60] sm:$0xff]  }
  0x29   :  { %423 = vmatprep.subr.bf16.mxu1 %v468_v7  ;;  %v471_v10 = vld [vmem:[#allocation5 + $0x10] sm:$0xff]   ;;  %v473_v13 = vld [vmem:[#allocation5 + $0x18] sm:$0xff]   ;;  %v475_v15 = vld [vmem:[#allocation5 + $0x20] sm:$0xff]   ;;  %v180_v24 = vsub.s32 0, %v179_v23  ;;  %v184_v28 = vsub.s32 1, %v179_v23 }
  0x2a   :  { %v123_v12 = vld [vmem:[%s637_s1] sm:$0x1]  ;;  %v476_v16 = vld [vmem:[#allocation5 + $0x68] sm:$0xff]   ;;  %v480_v20 = vld [vmem:[#allocation5 + $0x78] sm:$0xff]  }
  0x2b   :  { %446 = vmatpush3.bf16.msra.mxu0 %v464_v2  ;;  %v477_v17 = vld [vmem:[#allocation5 + $0x28] sm:$0xff]   ;;  %v478_v18 = vld [vmem:[#allocation5 + $0x70] sm:$0xff]   ;;  %v481_v21 = vld [vmem:[#allocation5 + $0x38] sm:$0xff]  }
  0x2c   :  { %451 = vmatprep.subr.bf16.mxu0 %v534_v0  ;;  %424 = vmatpush3.bf16.msra.mxu1 %v469_v8  ;;  %v479_v19 = vld [vmem:[#allocation5 + $0x30] sm:$0xff]  }
  0x2d   :  { %425 = vmatprep.subr.bf16.mxu1 %v470_v9  ;;  %v176_v25 = vld [vmem:[%s640_s4] sm:$0x3] }
  0x2e   :  { %448 = vmatmul.mubr.msk.bf16.vlgmr.msra.gmra.mrb[0].mxu0 %vm79_vm1, %v62_v3  ;;  %v181_v29 = vrot.slane %v176_v25, %v180_v24  ;;  %v185_v32 = vrot.slane %v176_v25, %v184_v28  ;;  %v398_v44 = vld [vmem:[%s642_s6] ss:$0 sm:$0xff] }
  0x2f   :  { %452 = vmatpush3.bf16.msra.mxu0 %v465_v4  ;;  %453 = vmatprep.mubr.msk.bf16.mxu0 %vm535_vm0, %v534_v0  ;;  %v415_v50 = vld [vmem:[%s643_s7] ss:$0 sm:$0xff] }
  0x30   :  { %426 = vmatpush3.bf16.msra.mxu1 %v471_v10 }
  0x31   :  { %427 = vmatprep.subr.bf16.mxu1 %v472_v11 }
  0x34   :  { %428 = vmatpush3.bf16.msra.mxu1 %v473_v13 }
  0x35   :  { %429 = vmatprep.subr.bf16.mxu1 %v474_v14 }
  0x36   :  { %454 = vmatmul.mubr.msk.bf16.vlgmr.msra.gmra.mrb[4].mxu0 %vm132_vm2, %v123_v12 }
  0x38   :  { %430 = vmatpush3.bf16.msra.mxu1 %v475_v15 }
  0x39   :  { %431 = vmatprep.subr.bf16.mxu1 %v476_v16 }
  0x3c   :  { %432 = vmatpush3.bf16.msra.mxu1 %v477_v17 }
  0x3d   :  { %433 = vmatprep.subr.bf16.mxu1 %v478_v18 }
  0x40   :  { %434 = vmatpush3.bf16.msra.mxu1 %v479_v19 }
  0x41   :  { %435 = vmatprep.subr.bf16.mxu1 %v480_v20 }
  0x44   :  { %436 = vmatpush3.bf16.msra.mxu1 %v481_v21 }
 0x101   :  { %v117_v26 = vpop.f32.mrb[0].mxu0 }
 0x102   :  { %v449_v27 = vpop.f32.mrb[1].mxu0  ;;  %v188_v33 = vadd.f32 %v181_v29, %v117_v26 }
 0x103   :  { %v120_v30 = vpop.f32.mrb[2].mxu0 }
 0x104   :  { %v450_v31 = vpop.f32.mrb[3].mxu0  ;;  %v190_v37 = vmax.f32 %v188_v33, 0.0 }
 0x106   :  { %v192_v42 = vpack.c.bf16 %v190_v37, %v190_v37 }
 0x109   :  { %v170_v34 = vpop.f32.mrb[4].mxu0 }
 0x10a   :  { %v189_v35 = vadd.f32 %v185_v32, %v170_v34  ;;  %v455_v36 = vpop.f32.mrb[5].mxu0 }
 0x10b   :  { %v173_v38 = vpop.f32.mrb[6].mxu0 }
 0x10c   :  { %v456_v39 = vpop.f32.mrb[7].mxu0  ;;  %v191_v40 = vmax.f32 %v189_v35, 0.0 }
 0x10e   :  { %v193_v41 = vpack.c.bf16 %v191_v40, %v191_v40 }
 0x110   :  { %361 = vmatprep.mubr.bf16.mxu1 %v193_v41 }
 0x111   :  { %362 = vmatmul.mubr.bf16.vlgmr.msra.gmra.mrb[0].mxu1 %v192_v42 }
 0x1e4   :  { %v437_v43 = vpop.f32.mrb[0].mxu1 }
 0x1e5   :  { %v438_v45 = vpop.f32.mrb[1].mxu1 }
 0x1e6   :  { %v439_v46 = vadd.f32 %v438_v45, %v437_v43  ;;  %v440_v47 = vpop.f32.mrb[2].mxu1 }
 0x1e7   :  { %v441_v48 = vpop.f32.mrb[3].mxu1 }
 0x1e8   :  { %v364_v49 = vadd.f32 %v439_v46, %v398_v44 }
 0x1ea   :  { %v369_v51 = vmax.f32 %v364_v49, 0.0 }
 0x1ec   :  { %v377_v52 = vmul.f32 %v415_v50, %v369_v51 }
 0x1ee   :  { %v379_v53 = vsel %vm378_vm3, %v377_v52, 0.0 }
 0x1ef   :  { %380 = vadd.xlane.f32.xlu0 %v379_v53 }
 0x27c   :  { %v381_v55 = vpop.xlane.xlu0 %380 }
 0x27d   :  { %v384_v56 = vadd.f32 %v383_v54, %v381_v55 }
 0x27f   :  { %386 = vst.msk [vmem:[%s645_s9] sm:$0x3] %vm385_vm4, %v384_v56 }
 0x280   :  { %391 = vsyncpa [#allocation4], 1 }
 0x281   :  { %392 = vsyncpa [#allocation6], 1 }

</bundles_post_ra>
